<compile_context>
chip_gen: v7x
topology: tpu7x:2x2x1
jax: 0.10.0
libtpu: 0.0.40
codegen_flags: <defaults>
</compile_context>

<pallas_src>
import functools
import math

import jax
import jax.numpy as jnp
from jax import lax
from jax.experimental import pallas as pl
from jax.experimental.pallas import tpu as pltpu


# ---------------------------------------------------------------------------
# Fused kernel: per-head projections + attention + fc accumulate + residual + LayerNorm
# ---------------------------------------------------------------------------
def _mha_fused_kernel(q_ref, k_ref, v_ref, wq_ref, wk_ref, wv_ref,
                      wfc_ref, gamma_ref, beta_ref, out_ref, *attn_refs,
                      n_head, d_k, d_v, eps, write_attn):
    attn_ref = attn_refs[0] if write_attn else None
    bb, len_q, d_model = q_ref.shape
    _, len_k, _ = k_ref.shape

    # Residual stays f32; MXU operands are bf16 (f32 accumulation).
    q_res = q_ref[...]                                              # (bb, Lq, d_model) f32
    q2 = q_res.reshape(bb * len_q, d_model).astype(jnp.bfloat16)
    k2 = k_ref[...].reshape(bb * len_k, d_model).astype(jnp.bfloat16)
    v2 = v_ref[...].reshape(bb * len_k, d_model).astype(jnp.bfloat16)

    # fc output accumulated per head (no lane-dim concat of head outputs).
    acc = jnp.zeros((bb * len_q, d_model), jnp.float32)

    for h in range(n_head):                      # n_head is small and static
        # Head-major weights: leading-axis slabs, no lane-offset slicing.
        wq_h = wq_ref[h]                         # (d_model, d_k), bf16, pre-scaled 1/temp
        wk_h = wk_ref[h]                         # (d_model, d_k)
        wv_h = wv_ref[h]                         # (d_model, d_v)
        wfc_h = wfc_ref[h]                       # (d_v, d_model)

        qh = jnp.dot(q2, wq_h, preferred_element_type=jnp.float32)  # (bb*Lq, d_k)
        kh = jnp.dot(k2, wk_h, preferred_element_type=jnp.float32)  # (bb*Lk, d_k)
        vh = jnp.dot(v2, wv_h, preferred_element_type=jnp.float32)  # (bb*Lk, d_v)

        qh = qh.reshape(bb, len_q, d_k).astype(jnp.bfloat16)
        kh = kh.reshape(bb, len_k, d_k).astype(jnp.bfloat16)
        vh = vh.reshape(bb, len_k, d_v).astype(jnp.bfloat16)

        # Batched scores over the whole batch block (1/temperature already in wq).
        s = jnp.einsum('bqd,bkd->bqk', qh, kh,
                       preferred_element_type=jnp.float32)          # (bb, Lq, Lk) f32

        # Softmax over keys (f32); EUP approx reciprocal + one Newton step.
        s = s - jnp.max(s, axis=-1, keepdims=True)
        e = jnp.exp(s)
        denom = jnp.sum(e, axis=-1, keepdims=True)
        r = pl.reciprocal(denom, approx=True)
        r = r * (2.0 - denom * r)
        p = e * r                                                    # (bb, Lq, Lk)

        if write_attn:
            attn_ref[h] = p                                          # leading-axis slab store

        o = jnp.einsum('bqk,bkd->bqd', p.astype(jnp.bfloat16), vh,
                       preferred_element_type=jnp.float32)           # (bb, Lq, d_v)

        # Fold this head straight into the fc projection (f32 accumulator).
        acc = acc + jnp.dot(o.reshape(bb * len_q, d_v).astype(jnp.bfloat16),
                            wfc_h, preferred_element_type=jnp.float32)

    # Fused residual + LayerNorm epilogue, once per grid step (f32).
    y = acc.reshape(bb, len_q, d_model) + q_res
    mean = jnp.mean(y, axis=-1, keepdims=True)
    var = jnp.mean(jnp.square(y - mean), axis=-1, keepdims=True)
    y = (y - mean) * lax.rsqrt(var + eps)
    out_ref[...] = y * gamma_ref[...] + beta_ref[...]


# ---------------------------------------------------------------------------
# VMEM sizing + batch-block auto-selection (sized for v7x's 64 MiB VMEM)
# ---------------------------------------------------------------------------
def _vmem_bytes_estimate(bb, Lq, Lk, n_head, d_model, d_k, d_v, write_attn):
    f32, bf16 = 4, 2
    # Double-buffered pipelined I/O blocks.
    b = 2 * (bb * Lq * d_model + 2 * bb * Lk * d_model) * f32        # q, k, v
    b += 2 * bb * Lq * d_model * f32                                 # output
    if write_attn:
        b += 2 * n_head * bb * Lq * Lk * f32                         # attention probs
    # Weights (bf16) + LayerNorm params (also double-buffered by the pipeline).
    b += 2 * (2 * n_head * d_model * d_k + 2 * n_head * d_model * d_v) * bf16
    b += 2 * 2 * d_model * f32
    # Live intermediates (rough upper bound).
    b += (bb * Lq + 2 * bb * Lk) * d_model * bf16                    # q2/k2/v2
    b += bb * (Lq * d_k + Lk * d_k + Lk * d_v) * f32                 # per-head projections
    b += 3 * bb * Lq * Lk * f32                                      # s / e / p
    b += bb * Lq * d_model * f32                                     # fc accumulator
    return b


def _auto_batch_block(B, Lq, Lk, n_head, d_model, d_k, d_v, write_attn,
                      vmem_budget_bytes=24 << 20):
    best = 1
    for bb in range(1, B + 1):
        if B % bb:
            continue
        if B >= 2 and B // bb < 2:
            # Keep at least 2 grid steps so both v7x TensorCores get work.
            continue
        if _vmem_bytes_estimate(bb, Lq, Lk, n_head, d_model, d_k, d_v,
                                write_attn) > vmem_budget_bytes:
            continue
        best = bb
        if bb * Lq >= 256:   # enough to fill the 256x256 MXU M dimension
            break
    return best


# ---------------------------------------------------------------------------
# Parameter prep (done once; weights are reused across calls)
# ---------------------------------------------------------------------------
def prepare_params(params, *, n_head, d_k, d_v):
    """Convert canonical (d_model, n_head*d) weights to head-major bf16 layout.

    Also folds 1/sqrt(d_k) into wq so the kernel never rescales activations.
    """
    d_model = params["wq"].shape[0]
    inv_temperature = 1.0 / float(math.sqrt(d_k))

    def head_major(w, d):   # (d_model, n_head*d) -> (n_head, d_model, d)
        return jnp.transpose(w.reshape(d_model, n_head, d), (1, 0, 2))

    return {
        "wq": (head_major(params["wq"], d_k) * inv_temperature).astype(jnp.bfloat16),
        "wk": head_major(params["wk"], d_k).astype(jnp.bfloat16),
        "wv": head_major(params["wv"], d_v).astype(jnp.bfloat16),
        "wfc": params["wfc"].reshape(n_head, d_v, d_model).astype(jnp.bfloat16),
        "gamma": params["gamma"].astype(jnp.float32),
        "beta": params["beta"].astype(jnp.float32),
    }


# ---------------------------------------------------------------------------
# Wrapper
# ---------------------------------------------------------------------------
def multi_head_attention(q, k, v, prepared, *, n_head, d_k, d_v,
                         batch_block=None, return_attn=True):
    """Forward pass equivalent to MultiHeadAttention.forward (eval mode, no mask).

    Returns (output, attn) with shapes (B, Lq, d_model) and (n_head*B, Lq, Lk),
    or just `output` when return_attn=False.
    """
    B, Lq, d_model = q.shape
    _, Lk, _ = k.shape
    if batch_block is None:
        batch_block = _auto_batch_block(B, Lq, Lk, n_head, d_model, d_k, d_v,
                                        return_attn)
    bb = batch_block
    assert B % bb == 0, "batch_block must divide batch size"

    kernel = functools.partial(
        _mha_fused_kernel,
        n_head=n_head, d_k=d_k, d_v=d_v, eps=1e-5, write_attn=return_attn)

    out_shapes = [jax.ShapeDtypeStruct((B, Lq, d_model), jnp.float32)]
    out_specs = [pl.BlockSpec((bb, Lq, d_model), lambda b: (b, 0, 0))]
    if return_attn:
        out_shapes.append(jax.ShapeDtypeStruct((n_head, B, Lq, Lk), jnp.float32))
        out_specs.append(pl.BlockSpec((n_head, bb, Lq, Lk), lambda b: (0, b, 0, 0)))

    vmem_limit = int(min(max(
        1.25 * _vmem_bytes_estimate(bb, Lq, Lk, n_head, d_model, d_k, d_v, return_attn),
        32 << 20), 64 << 20))

    fused = pl.pallas_call(
        kernel,
        out_shape=tuple(out_shapes),
        grid_spec=pltpu.PrefetchScalarGridSpec(
            num_scalar_prefetch=0,
            grid=(B // bb,),
            in_specs=[
                pl.BlockSpec((bb, Lq, d_model), lambda b: (b, 0, 0)),       # q
                pl.BlockSpec((bb, Lk, d_model), lambda b: (b, 0, 0)),       # k
                pl.BlockSpec((bb, Lk, d_model), lambda b: (b, 0, 0)),       # v
                pl.BlockSpec((n_head, d_model, d_k), lambda b: (0, 0, 0)),  # wq (full)
                pl.BlockSpec((n_head, d_model, d_k), lambda b: (0, 0, 0)),  # wk (full)
                pl.BlockSpec((n_head, d_model, d_v), lambda b: (0, 0, 0)),  # wv (full)
                pl.BlockSpec((n_head, d_v, d_model), lambda b: (0, 0, 0)),  # wfc (full)
                pl.BlockSpec((1, d_model), lambda b: (0, 0)),               # gamma
                pl.BlockSpec((1, d_model), lambda b: (0, 0)),               # beta
            ],
            out_specs=tuple(out_specs),
        ),
        compiler_params=pltpu.CompilerParams(
            dimension_semantics=("parallel",),
            vmem_limit_bytes=vmem_limit),
    )
    results = fused(q, k, v, prepared["wq"], prepared["wk"], prepared["wv"],
                    prepared["wfc"], prepared["gamma"], prepared["beta"])

    if return_attn:
        output, attn4 = results
        # (n_head, B, Lq, Lk) -> (n_head*B, Lq, Lk): pure contiguous reshape, no transpose.
        attn = attn4.reshape(n_head * B, Lq, Lk)
        return output, attn
    return results[0]


# ---------------------------------------------------------------------------
# Pure-JAX f32 reference (mirrors the PyTorch forward) for correctness checking
# ---------------------------------------------------------------------------
def _reference(q, k, v, params, *, n_head, d_k, d_v):
    B, Lq, d_model = q.shape
    _, Lk, _ = k.shape
    qh = (q @ params["wq"]).reshape(B, Lq, n_head, d_k)
    kh = (k @ params["wk"]).reshape(B, Lk, n_head, d_k)
    vh = (v @ params["wv"]).reshape(B, Lk, n_head, d_v)
    qh = jnp.transpose(qh, (2, 0, 1, 3)).reshape(-1, Lq, d_k)
    kh = jnp.transpose(kh, (2, 0, 1, 3)).reshape(-1, Lk, d_k)
    vh = jnp.transpose(vh, (2, 0, 1, 3)).reshape(-1, Lk, d_v)
    scores = jnp.einsum("bqd,bkd->bqk", qh, kh) / math.sqrt(d_k)
    attn = jax.nn.softmax(scores, axis=2)
    out = jnp.einsum("bqk,bkd->bqd", attn, vh)
    out = out.reshape(n_head, B, Lq, d_v)
    out = jnp.transpose(out, (1, 2, 0, 3)).reshape(B, Lq, -1)
    out = out @ params["wfc"] + q
    mean = jnp.mean(out, axis=-1, keepdims=True)
    var = jnp.mean(jnp.square(out - mean), axis=-1, keepdims=True)
    out = (out - mean) / jnp.sqrt(var + 1e-5)
    out = out * params["gamma"][0] + params["beta"][0]
    return out, attn


if __name__ == "__main__":
    # Small shapes consistent with the module.
    B, L, d_model = 2, 8, 32
    n_head, d_k, d_v = 2, 16, 16

    key = jax.random.PRNGKey(0)
    kq, kk, kv, kwq, kwk, kwv, kwfc = jax.random.split(key, 7)

    q = jax.random.normal(kq, (B, L, d_model), dtype=jnp.float32)
    k = jax.random.normal(kk, (B, L, d_model), dtype=jnp.float32)
    v = jax.random.normal(kv, (B, L, d_model), dtype=jnp.float32)

    # Deterministic parameter init, matching the PyTorch init distributions.
    std_qk = math.sqrt(2.0 / (d_model + d_k))
    std_v = math.sqrt(2.0 / (d_model + d_v))
    std_fc = math.sqrt(2.0 / (n_head * d_v + d_model))   # xavier_normal_
    params = {
        "wq": std_qk * jax.random.normal(kwq, (d_model, n_head * d_k), dtype=jnp.float32),
        "wk": std_qk * jax.random.normal(kwk, (d_model, n_head * d_k), dtype=jnp.float32),
        "wv": std_v * jax.random.normal(kwv, (d_model, n_head * d_v), dtype=jnp.float32),
        "wfc": std_fc * jax.random.normal(kwfc, (n_head * d_v, d_model), dtype=jnp.float32),
        "gamma": jnp.ones((1, d_model), dtype=jnp.float32),
        "beta": jnp.zeros((1, d_model), dtype=jnp.float32),
    }

    prepared = prepare_params(params, n_head=n_head, d_k=d_k, d_v=d_v)

    out, attn = multi_head_attention(q, k, v, prepared,
                                     n_head=n_head, d_k=d_k, d_v=d_v)
    out = jax.block_until_ready(out)
    attn = jax.block_until_ready(attn)

    ref_out, ref_attn = _reference(q, k, v, params, n_head=n_head, d_k=d_k, d_v=d_v)
    assert out.shape == (B, L, d_model)
    assert attn.shape == (n_head * B, L, L)
    # Tolerances loosened for bf16 MXU operands (f32 accumulation, f32 softmax/LN).
    assert jnp.allclose(out, ref_out, atol=5e-2, rtol=5e-2)
    assert jnp.allclose(attn, ref_attn, atol=2e-2, rtol=2e-2)

    # Fast path: skip the attention-probability writeback entirely.
    out2 = multi_head_attention(q, k, v, prepared,
                                n_head=n_head, d_k=d_k, d_v=d_v, return_attn=False)
    out2 = jax.block_until_ready(out2)
    assert out2.shape == (B, L, d_model)
    assert jnp.allclose(out2, ref_out, atol=5e-2, rtol=5e-2)

    print("KERNEL_OK")
</pallas_src>

<mosaic_0001>
module attributes {stable_mosaic.version = 11 : i64} {
  func.func @_mha_fused_kernel(%arg0: i32, %arg1: memref<1x8x32xf32, #tpu.memory_space<vmem>>, %arg2: memref<1x8x32xf32, #tpu.memory_space<vmem>>, %arg3: memref<1x8x32xf32, #tpu.memory_space<vmem>>, %arg4: memref<2x32x16xbf16, #tpu.memory_space<vmem>>, %arg5: memref<2x32x16xbf16, #tpu.memory_space<vmem>>, %arg6: memref<2x32x16xbf16, #tpu.memory_space<vmem>>, %arg7: memref<2x16x32xbf16, #tpu.memory_space<vmem>>, %arg8: memref<1x32xf32, #tpu.memory_space<vmem>>, %arg9: memref<1x32xf32, #tpu.memory_space<vmem>>, %arg10: memref<1x8x32xf32, #tpu.memory_space<vmem>>, %arg11: memref<2x1x8x8xf32, #tpu.memory_space<vmem>>) attributes {dimension_semantics = [#tpu.dimension_semantics<parallel>], iteration_bounds = array<i64: 2>, scalar_prefetch = 0 : i64, scratch_operands = 0 : i64, tpu.core_type = #tpu.core_type<tc>, window_params = [{transform_indices = @transform_0, window_bounds = array<i64: 1, 8, 32>}, {transform_indices = @transform_1, window_bounds = array<i64: 1, 8, 32>}, {transform_indices = @transform_2, window_bounds = array<i64: 1, 8, 32>}, {pipeline_mode = #tpu.pipeline_mode<synchronous>, transform_indices = @transform_3, window_bounds = array<i64: 2, 32, 16>}, {pipeline_mode = #tpu.pipeline_mode<synchronous>, transform_indices = @transform_4, window_bounds = array<i64: 2, 32, 16>}, {pipeline_mode = #tpu.pipeline_mode<synchronous>, transform_indices = @transform_5, window_bounds = array<i64: 2, 32, 16>}, {pipeline_mode = #tpu.pipeline_mode<synchronous>, transform_indices = @transform_6, window_bounds = array<i64: 2, 16, 32>}, {pipeline_mode = #tpu.pipeline_mode<synchronous>, transform_indices = @transform_7, window_bounds = array<i64: 1, 32>}, {pipeline_mode = #tpu.pipeline_mode<synchronous>, transform_indices = @transform_8, window_bounds = array<i64: 1, 32>}, {transform_indices = @transform_9, window_bounds = array<i64: 1, 8, 32>}, {transform_indices = @transform_10, window_bounds = array<i64: 2, 1, 8, 8>}]} {
    %c0 = arith.constant 0 : index
    %c0_0 = arith.constant 0 : index
    %c0_1 = arith.constant 0 : index
    %0 = vector.load %arg1[%c0, %c0_0, %c0_1] : memref<1x8x32xf32, #tpu.memory_space<vmem>>, vector<1x8x32xf32>
    %1 = vector.shape_cast %0 : vector<1x8x32xf32> to vector<8x32xf32>
    %2 = arith.truncf %1 : vector<8x32xf32> to vector<8x32xbf16>
    %c0_2 = arith.constant 0 : index
    %c0_3 = arith.constant 0 : index
    %c0_4 = arith.constant 0 : index
    %3 = vector.load %arg2[%c0_2, %c0_3, %c0_4] : memref<1x8x32xf32, #tpu.memory_space<vmem>>, vector<1x8x32xf32>
    %4 = vector.shape_cast %3 : vector<1x8x32xf32> to vector<8x32xf32>
    %5 = arith.truncf %4 : vector<8x32xf32> to vector<8x32xbf16>
    %c0_5 = arith.constant 0 : index
    %c0_6 = arith.constant 0 : index
    %c0_7 = arith.constant 0 : index
    %6 = vector.load %arg3[%c0_5, %c0_6, %c0_7] : memref<1x8x32xf32, #tpu.memory_space<vmem>>, vector<1x8x32xf32>
    %7 = vector.shape_cast %6 : vector<1x8x32xf32> to vector<8x32xf32>
    %8 = arith.truncf %7 : vector<8x32xf32> to vector<8x32xbf16>
    %cst = arith.constant 0.000000e+00 : f32
    %9 = vector.broadcast %cst : f32 to vector<8x32xf32>
    %c0_8 = arith.constant 0 : index
    %c0_9 = arith.constant 0 : index
    %c0_10 = arith.constant 0 : index
    %10 = vector.load %arg4[%c0_8, %c0_9, %c0_10] : memref<2x32x16xbf16, #tpu.memory_space<vmem>>, vector<1x32x16xbf16>
    %11 = vector.shape_cast %10 : vector<1x32x16xbf16> to vector<32x16xbf16>
    %c0_11 = arith.constant 0 : index
    %c0_12 = arith.constant 0 : index
    %c0_13 = arith.constant 0 : index
    %12 = vector.load %arg5[%c0_11, %c0_12, %c0_13] : memref<2x32x16xbf16, #tpu.memory_space<vmem>>, vector<1x32x16xbf16>
    %13 = vector.shape_cast %12 : vector<1x32x16xbf16> to vector<32x16xbf16>
    %c0_14 = arith.constant 0 : index
    %c0_15 = arith.constant 0 : index
    %c0_16 = arith.constant 0 : index
    %14 = vector.load %arg6[%c0_14, %c0_15, %c0_16] : memref<2x32x16xbf16, #tpu.memory_space<vmem>>, vector<1x32x16xbf16>
    %15 = vector.shape_cast %14 : vector<1x32x16xbf16> to vector<32x16xbf16>
    %c0_17 = arith.constant 0 : index
    %c0_18 = arith.constant 0 : index
    %c0_19 = arith.constant 0 : index
    %16 = vector.load %arg7[%c0_17, %c0_18, %c0_19] : memref<2x16x32xbf16, #tpu.memory_space<vmem>>, vector<1x16x32xbf16>
    %17 = vector.shape_cast %16 : vector<1x16x32xbf16> to vector<16x32xbf16>
    %cst_20 = arith.constant dense<0.000000e+00> : vector<8x16xf32>
    %18 = tpu.matmul %2, %11, %cst_20 {dimension_numbers = #tpu.dot_dimension_numbers<[1], [0], [0], [1], [0, 0, 1, 1], [], []>} : vector<8x32xbf16>, vector<32x16xbf16>, vector<8x16xf32> -> vector<8x16xf32>
    %cst_21 = arith.constant dense<0.000000e+00> : vector<8x16xf32>
    %19 = tpu.matmul %5, %13, %cst_21 {dimension_numbers = #tpu.dot_dimension_numbers<[1], [0], [0], [1], [0, 0, 1, 1], [], []>} : vector<8x32xbf16>, vector<32x16xbf16>, vector<8x16xf32> -> vector<8x16xf32>
    %cst_22 = arith.constant dense<0.000000e+00> : vector<8x16xf32>
    %20 = tpu.matmul %8, %15, %cst_22 {dimension_numbers = #tpu.dot_dimension_numbers<[1], [0], [0], [1], [0, 0, 1, 1], [], []>} : vector<8x32xbf16>, vector<32x16xbf16>, vector<8x16xf32> -> vector<8x16xf32>
    %21 = vector.shape_cast %18 : vector<8x16xf32> to vector<1x8x16xf32>
    %22 = arith.truncf %21 : vector<1x8x16xf32> to vector<1x8x16xbf16>
    %23 = vector.shape_cast %19 : vector<8x16xf32> to vector<1x8x16xf32>
    %24 = arith.truncf %23 : vector<1x8x16xf32> to vector<1x8x16xbf16>
    %25 = vector.shape_cast %20 : vector<8x16xf32> to vector<1x8x16xf32>
    %26 = arith.truncf %25 : vector<1x8x16xf32> to vector<1x8x16xbf16>
    "tpu.trace_start"() <{level = 10 : i32, message = "bqd,bkd->bqk"}> : () -> ()
    %cst_23 = arith.constant dense<0.000000e+00> : vector<1x8x8xf32>
    %27 = tpu.matmul %22, %24, %cst_23 {dimension_numbers = #tpu.dot_dimension_numbers<[2], [2], [1], [1], [0, 0, 0, 1, 1, 1], [0], [0]>} : vector<1x8x16xbf16>, vector<1x8x16xbf16>, vector<1x8x8xf32> -> vector<1x8x8xf32>
    "tpu.trace_stop"() : () -> ()
    %cst_24 = arith.constant dense<0xFF800000> : vector<1x8xf32>
    %28 = vector.multi_reduction <maximumf>, %27, %cst_24 [2] : vector<1x8x8xf32> to vector<1x8xf32>
    %29 = vector.shape_cast %28 : vector<1x8xf32> to vector<1x8x1xf32>
    %30 = vector.broadcast %29 : vector<1x8x1xf32> to vector<1x8x8xf32>
    %31 = arith.subf %27, %30 : vector<1x8x8xf32>
    %32 = math.exp %31 : vector<1x8x8xf32>
    %cst_25 = arith.constant dense<0.000000e+00> : vector<1x8xf32>
    %33 = vector.multi_reduction <add>, %32, %cst_25 [2] : vector<1x8x8xf32> to vector<1x8xf32>
    %34 = vector.shape_cast %33 : vector<1x8xf32> to vector<1x8x1xf32>
    %35 = tpu.reciprocal %34 {approx = true} : vector<1x8x1xf32> -> vector<1x8x1xf32>
    %36 = arith.mulf %34, %35 : vector<1x8x1xf32>
    %cst_26 = arith.constant 2.000000e+00 : f32
    %37 = vector.broadcast %cst_26 : f32 to vector<1x8x1xf32>
    %38 = arith.subf %37, %36 : vector<1x8x1xf32>
    %39 = arith.mulf %35, %38 : vector<1x8x1xf32>
    %40 = vector.broadcast %39 : vector<1x8x1xf32> to vector<1x8x8xf32>
    %41 = arith.mulf %32, %40 : vector<1x8x8xf32>
    %c0_27 = arith.constant 0 : index
    %c0_28 = arith.constant 0 : index
    %c0_29 = arith.constant 0 : index
    %c0_30 = arith.constant 0 : index
    %42 = vector.load %arg11[%c0_27, %c0_28, %c0_29, %c0_30] : memref<2x1x8x8xf32, #tpu.memory_space<vmem>>, vector<1x1x8x8xf32>
    %43 = vector.shape_cast %42 : vector<1x1x8x8xf32> to vector<1x8x8xf32>
    %44 = vector.shape_cast %41 : vector<1x8x8xf32> to vector<1x1x8x8xf32>
    tpu.vector_store %arg11[%c0_27, %c0_28, %c0_29, %c0_30], %44 {strides = array<i32>} : memref<2x1x8x8xf32, #tpu.memory_space<vmem>>, vector<1x1x8x8xf32>,
    %45 = arith.truncf %41 : vector<1x8x8xf32> to vector<1x8x8xbf16>
    "tpu.trace_start"() <{level = 10 : i32, message = "bqk,bkd->bqd"}> : () -> ()
    %cst_31 = arith.constant dense<0.000000e+00> : vector<1x8x16xf32>
    %46 = tpu.matmul %45, %26, %cst_31 {dimension_numbers = #tpu.dot_dimension_numbers<[2], [1], [1], [2], [0, 0, 0, 1, 1, 2], [0], [0]>} : vector<1x8x8xbf16>, vector<1x8x16xbf16>, vector<1x8x16xf32> -> vector<1x8x16xf32>
    "tpu.trace_stop"() : () -> ()
    %47 = vector.shape_cast %46 : vector<1x8x16xf32> to vector<8x16xf32>
    %48 = arith.truncf %47 : vector<8x16xf32> to vector<8x16xbf16>
    %cst_32 = arith.constant dense<0.000000e+00> : vector<8x32xf32>
    %49 = tpu.matmul %48, %17, %cst_32 {dimension_numbers = #tpu.dot_dimension_numbers<[1], [0], [0], [1], [0, 0, 1, 1], [], []>} : vector<8x16xbf16>, vector<16x32xbf16>, vector<8x32xf32> -> vector<8x32xf32>
    %50 = arith.addf %9, %49 : vector<8x32xf32>
    %c1 = arith.constant 1 : index
    %c0_33 = arith.constant 0 : index
    %c0_34 = arith.constant 0 : index
    %51 = vector.load %arg4[%c1, %c0_33, %c0_34] : memref<2x32x16xbf16, #tpu.memory_space<vmem>>, vector<1x32x16xbf16>
    %52 = vector.shape_cast %51 : vector<1x32x16xbf16> to vector<32x16xbf16>
    %c1_35 = arith.constant 1 : index
    %c0_36 = arith.constant 0 : index
    %c0_37 = arith.constant 0 : index
    %53 = vector.load %arg5[%c1_35, %c0_36, %c0_37] : memref<2x32x16xbf16, #tpu.memory_space<vmem>>, vector<1x32x16xbf16>
    %54 = vector.shape_cast %53 : vector<1x32x16xbf16> to vector<32x16xbf16>
    %c1_38 = arith.constant 1 : index
    %c0_39 = arith.constant 0 : index
    %c0_40 = arith.constant 0 : index
    %55 = vector.load %arg6[%c1_38, %c0_39, %c0_40] : memref<2x32x16xbf16, #tpu.memory_space<vmem>>, vector<1x32x16xbf16>
    %56 = vector.shape_cast %55 : vector<1x32x16xbf16> to vector<32x16xbf16>
    %c1_41 = arith.constant 1 : index
    %c0_42 = arith.constant 0 : index
    %c0_43 = arith.constant 0 : index
    %57 = vector.load %arg7[%c1_41, %c0_42, %c0_43] : memref<2x16x32xbf16, #tpu.memory_space<vmem>>, vector<1x16x32xbf16>
    %58 = vector.shape_cast %57 : vector<1x16x32xbf16> to vector<16x32xbf16>
    %cst_44 = arith.constant dense<0.000000e+00> : vector<8x16xf32>
    %59 = tpu.matmul %2, %52, %cst_44 {dimension_numbers = #tpu.dot_dimension_numbers<[1], [0], [0], [1], [0, 0, 1, 1], [], []>} : vector<8x32xbf16>, vector<32x16xbf16>, vector<8x16xf32> -> vector<8x16xf32>
    %cst_45 = arith.constant dense<0.000000e+00> : vector<8x16xf32>
    %60 = tpu.matmul %5, %54, %cst_45 {dimension_numbers = #tpu.dot_dimension_numbers<[1], [0], [0], [1], [0, 0, 1, 1], [], []>} : vector<8x32xbf16>, vector<32x16xbf16>, vector<8x16xf32> -> vector<8x16xf32>
    %cst_46 = arith.constant dense<0.000000e+00> : vector<8x16xf32>
    %61 = tpu.matmul %8, %56, %cst_46 {dimension_numbers = #tpu.dot_dimension_numbers<[1], [0], [0], [1], [0, 0, 1, 1], [], []>} : vector<8x32xbf16>, vector<32x16xbf16>, vector<8x16xf32> -> vector<8x16xf32>
    %62 = vector.shape_cast %59 : vector<8x16xf32> to vector<1x8x16xf32>
    %63 = arith.truncf %62 : vector<1x8x16xf32> to vector<1x8x16xbf16>
    %64 = vector.shape_cast %60 : vector<8x16xf32> to vector<1x8x16xf32>
    %65 = arith.truncf %64 : vector<1x8x16xf32> to vector<1x8x16xbf16>
    %66 = vector.shape_cast %61 : vector<8x16xf32> to vector<1x8x16xf32>
    %67 = arith.truncf %66 : vector<1x8x16xf32> to vector<1x8x16xbf16>
    "tpu.trace_start"() <{level = 10 : i32, message = "bqd,bkd->bqk"}> : () -> ()
    %cst_47 = arith.constant dense<0.000000e+00> : vector<1x8x8xf32>
    %68 = tpu.matmul %63, %65, %cst_47 {dimension_numbers = #tpu.dot_dimension_numbers<[2], [2], [1], [1], [0, 0, 0, 1, 1, 1], [0], [0]>} : vector<1x8x16xbf16>, vector<1x8x16xbf16>, vector<1x8x8xf32> -> vector<1x8x8xf32>
    "tpu.trace_stop"() : () -> ()
    %cst_48 = arith.constant dense<0xFF800000> : vector<1x8xf32>
    %69 = vector.multi_reduction <maximumf>, %68, %cst_48 [2] : vector<1x8x8xf32> to vector<1x8xf32>
    %70 = vector.shape_cast %69 : vector<1x8xf32> to vector<1x8x1xf32>
    %71 = vector.broadcast %70 : vector<1x8x1xf32> to vector<1x8x8xf32>
    %72 = arith.subf %68, %71 : vector<1x8x8xf32>
    %73 = math.exp %72 : vector<1x8x8xf32>
    %cst_49 = arith.constant dense<0.000000e+00> : vector<1x8xf32>
    %74 = vector.multi_reduction <add>, %73, %cst_49 [2] : vector<1x8x8xf32> to vector<1x8xf32>
    %75 = vector.shape_cast %74 : vector<1x8xf32> to vector<1x8x1xf32>
    %76 = tpu.reciprocal %75 {approx = true} : vector<1x8x1xf32> -> vector<1x8x1xf32>
    %77 = arith.mulf %75, %76 : vector<1x8x1xf32>
    %cst_50 = arith.constant 2.000000e+00 : f32
    %78 = vector.broadcast %cst_50 : f32 to vector<1x8x1xf32>
    %79 = arith.subf %78, %77 : vector<1x8x1xf32>
    %80 = arith.mulf %76, %79 : vector<1x8x1xf32>
    %81 = vector.broadcast %80 : vector<1x8x1xf32> to vector<1x8x8xf32>
    %82 = arith.mulf %73, %81 : vector<1x8x8xf32>
    %c1_51 = arith.constant 1 : index
    %c0_52 = arith.constant 0 : index
    %c0_53 = arith.constant 0 : index
    %c0_54 = arith.constant 0 : index
    %83 = vector.load %arg11[%c1_51, %c0_52, %c0_53, %c0_54] : memref<2x1x8x8xf32, #tpu.memory_space<vmem>>, vector<1x1x8x8xf32>
    %84 = vector.shape_cast %83 : vector<1x1x8x8xf32> to vector<1x8x8xf32>
    %85 = vector.shape_cast %82 : vector<1x8x8xf32> to vector<1x1x8x8xf32>
    tpu.vector_store %arg11[%c1_51, %c0_52, %c0_53, %c0_54], %85 {strides = array<i32>} : memref<2x1x8x8xf32, #tpu.memory_space<vmem>>, vector<1x1x8x8xf32>,
    %86 = arith.truncf %82 : vector<1x8x8xf32> to vector<1x8x8xbf16>
    "tpu.trace_start"() <{level = 10 : i32, message = "bqk,bkd->bqd"}> : () -> ()
    %cst_55 = arith.constant dense<0.000000e+00> : vector<1x8x16xf32>
    %87 = tpu.matmul %86, %67, %cst_55 {dimension_numbers = #tpu.dot_dimension_numbers<[2], [1], [1], [2], [0, 0, 0, 1, 1, 2], [0], [0]>} : vector<1x8x8xbf16>, vector<1x8x16xbf16>, vector<1x8x16xf32> -> vector<1x8x16xf32>
    "tpu.trace_stop"() : () -> ()
    %88 = vector.shape_cast %87 : vector<1x8x16xf32> to vector<8x16xf32>
    %89 = arith.truncf %88 : vector<8x16xf32> to vector<8x16xbf16>
    %cst_56 = arith.constant dense<0.000000e+00> : vector<8x32xf32>
    %90 = tpu.matmul %89, %58, %cst_56 {dimension_numbers = #tpu.dot_dimension_numbers<[1], [0], [0], [1], [0, 0, 1, 1], [], []>} : vector<8x16xbf16>, vector<16x32xbf16>, vector<8x32xf32> -> vector<8x32xf32>
    %91 = arith.addf %50, %90 : vector<8x32xf32>
    %92 = vector.shape_cast %91 : vector<8x32xf32> to vector<1x8x32xf32>
    %93 = arith.addf %92, %0 : vector<1x8x32xf32>
    %cst_57 = arith.constant dense<0.000000e+00> : vector<1x8xf32>
    %94 = vector.multi_reduction <add>, %93, %cst_57 [2] : vector<1x8x32xf32> to vector<1x8xf32>
    %95 = vector.shape_cast %94 : vector<1x8xf32> to vector<1x8x1xf32>
    %cst_58 = arith.constant 3.200000e+01 : f32
    %96 = vector.broadcast %cst_58 : f32 to vector<1x8x1xf32>
    %97 = arith.divf %95, %96 : vector<1x8x1xf32>
    %98 = vector.broadcast %97 : vector<1x8x1xf32> to vector<1x8x32xf32>
    %99 = arith.subf %93, %98 : vector<1x8x32xf32>
    %100 = arith.mulf %99, %99 : vector<1x8x32xf32>
    %cst_59 = arith.constant dense<0.000000e+00> : vector<1x8xf32>
    %101 = vector.multi_reduction <add>, %100, %cst_59 [2] : vector<1x8x32xf32> to vector<1x8xf32>
    %102 = vector.shape_cast %101 : vector<1x8xf32> to vector<1x8x1xf32>
    %cst_60 = arith.constant 3.200000e+01 : f32
    %103 = vector.broadcast %cst_60 : f32 to vector<1x8x1xf32>
    %104 = arith.divf %102, %103 : vector<1x8x1xf32>
    %105 = vector.broadcast %97 : vector<1x8x1xf32> to vector<1x8x32xf32>
    %106 = arith.subf %93, %105 : vector<1x8x32xf32>
    %cst_61 = arith.constant 9.99999974E-6 : f32
    %107 = vector.broadcast %cst_61 : f32 to vector<1x8x1xf32>
    %108 = arith.addf %104, %107 : vector<1x8x1xf32>
    %109 = math.rsqrt %108 : vector<1x8x1xf32>
    %110 = vector.broadcast %109 : vector<1x8x1xf32> to vector<1x8x32xf32>
    %111 = arith.mulf %106, %110 : vector<1x8x32xf32>
    %c0_62 = arith.constant 0 : index
    %c0_63 = arith.constant 0 : index
    %112 = vector.load %arg8[%c0_62, %c0_63] : memref<1x32xf32, #tpu.memory_space<vmem>>, vector<1x32xf32>
    %113 = vector.shape_cast %112 : vector<1x32xf32> to vector<1x1x32xf32>
    %114 = vector.broadcast %113 : vector<1x1x32xf32> to vector<1x8x32xf32>
    %115 = arith.mulf %111, %114 : vector<1x8x32xf32>
    %c0_64 = arith.constant 0 : index
    %c0_65 = arith.constant 0 : index
    %116 = vector.load %arg9[%c0_64, %c0_65] : memref<1x32xf32, #tpu.memory_space<vmem>>, vector<1x32xf32>
    %117 = vector.shape_cast %116 : vector<1x32xf32> to vector<1x1x32xf32>
    %118 = vector.broadcast %117 : vector<1x1x32xf32> to vector<1x8x32xf32>
    %119 = arith.addf %115, %118 : vector<1x8x32xf32>
    %c0_66 = arith.constant 0 : index
    %c0_67 = arith.constant 0 : index
    %c0_68 = arith.constant 0 : index
    %120 = vector.load %arg10[%c0_66, %c0_67, %c0_68] : memref<1x8x32xf32, #tpu.memory_space<vmem>>, vector<1x8x32xf32>
    tpu.vector_store %arg10[%c0_66, %c0_67, %c0_68], %119 {strides = array<i32>} : memref<1x8x32xf32, #tpu.memory_space<vmem>>, vector<1x8x32xf32>,
    return
  }
  func.func @transform_0(%arg0: i32) -> (i32, i32, i32) {
    %c0_i32 = arith.constant 0 : i32
    %c0_i32_0 = arith.constant 0 : i32
    %c0_i32_1 = arith.constant 0 : i32
    return %arg0, %c0_i32, %c0_i32_0 : i32, i32, i32
  }
  func.func @transform_1(%arg0: i32) -> (i32, i32, i32) {
    %c0_i32 = arith.constant 0 : i32
    %c0_i32_0 = arith.constant 0 : i32
    %c0_i32_1 = arith.constant 0 : i32
    return %arg0, %c0_i32, %c0_i32_0 : i32, i32, i32
  }
  func.func @transform_2(%arg0: i32) -> (i32, i32, i32) {
    %c0_i32 = arith.constant 0 : i32
    %c0_i32_0 = arith.constant 0 : i32
    %c0_i32_1 = arith.constant 0 : i32
    return %arg0, %c0_i32, %c0_i32_0 : i32, i32, i32
  }
  func.func @transform_3(%arg0: i32) -> (i32, i32, i32) {
    %c0_i32 = arith.constant 0 : i32
    %c0_i32_0 = arith.constant 0 : i32
    %c0_i32_1 = arith.constant 0 : i32
    %c0_i32_2 = arith.constant 0 : i32
    return %c0_i32, %c0_i32_0, %c0_i32_1 : i32, i32, i32
  }
  func.func @transform_4(%arg0: i32) -> (i32, i32, i32) {
    %c0_i32 = arith.constant 0 : i32
    %c0_i32_0 = arith.constant 0 : i32
    %c0_i32_1 = arith.constant 0 : i32
    %c0_i32_2 = arith.constant 0 : i32
    return %c0_i32, %c0_i32_0, %c0_i32_1 : i32, i32, i32
  }
  func.func @transform_5(%arg0: i32) -> (i32, i32, i32) {
    %c0_i32 = arith.constant 0 : i32
    %c0_i32_0 = arith.constant 0 : i32
    %c0_i32_1 = arith.constant 0 : i32
    %c0_i32_2 = arith.constant 0 : i32
    return %c0_i32, %c0_i32_0, %c0_i32_1 : i32, i32, i32
  }
  func.func @transform_6(%arg0: i32) -> (i32, i32, i32) {
    %c0_i32 = arith.constant 0 : i32
    %c0_i32_0 = arith.constant 0 : i32
    %c0_i32_1 = arith.constant 0 : i32
    %c0_i32_2 = arith.constant 0 : i32
    return %c0_i32, %c0_i32_0, %c0_i32_1 : i32, i32, i32
  }
  func.func @transform_7(%arg0: i32) -> (i32, i32) {
    %c0_i32 = arith.constant 0 : i32
    %c0_i32_0 = arith.constant 0 : i32
    %c0_i32_1 = arith.constant 0 : i32
    return %c0_i32, %c0_i32_0 : i32, i32
  }
  func.func @transform_8(%arg0: i32) -> (i32, i32) {
    %c0_i32 = arith.constant 0 : i32
    %c0_i32_0 = arith.constant 0 : i32
    %c0_i32_1 = arith.constant 0 : i32
    return %c0_i32, %c0_i32_0 : i32, i32
  }
  func.func @transform_9(%arg0: i32) -> (i32, i32, i32) {
    %c0_i32 = arith.constant 0 : i32
    %c0_i32_0 = arith.constant 0 : i32
    %c0_i32_1 = arith.constant 0 : i32
    return %arg0, %c0_i32, %c0_i32_0 : i32, i32, i32
  }
  func.func @transform_10(%arg0: i32) -> (i32, i32, i32, i32) {
    %c0_i32 = arith.constant 0 : i32
    %c0_i32_0 = arith.constant 0 : i32
    %c0_i32_1 = arith.constant 0 : i32
    %c0_i32_2 = arith.constant 0 : i32
    return %c0_i32, %arg0, %c0_i32_0, %c0_i32_1 : i32, i32, i32, i32
  }
}

</mosaic_0001>

<bundles_post_ra>
// kernel: tpu_custom_call.1
= control target key start
LH: loop header
LB: loop body
LE: loop exit
PB: predicated region body
PF: predicated region fallthrough
CT: control target
= control target key end

     0   :  { %s1955_s0 = inlined_call_operand.vmem [shape: f32[2,8,32], index: 0, kind: input, shape index: {}]   ;;  %s1956_s1 = inlined_call_operand.vmem [shape: f32[2,8,32], index: 1, kind: input, shape index: {}]   ;;  %s1957_s2 = inlined_call_operand.vmem [shape: f32[2,8,32], index: 2, kind: input, shape index: {}]   ;;  %s1958_s3 = inlined_call_operand.vmem [shape: bf16[2,32,16], index: 3, kind: input, shape index: {}]   ;;  %s1959_s4 = inlined_call_operand.vmem [shape: bf16[2,32,16], index: 4, kind: input, shape index: {}]   ;;  %s1960_s5 = inlined_call_operand.vmem [shape: bf16[2,32,16], index: 5, kind: input, shape index: {}]   ;;  %s1961_s6 = inlined_call_operand.vmem [shape: bf16[2,16,32], index: 6, kind: input, shape index: {}]   ;;  %s1962_s7 = inlined_call_operand.vmem [shape: f32[1,32], index: 7, kind: input, shape index: {}]   ;;  %s1963_s8 = inlined_call_operand.vmem [shape: f32[1,32], index: 8, kind: input, shape index: {}]   ;;  %s1964_s9 = inlined_call_operand.hbm [shape: f32[2,8,32], index: 9, kind: output, shape index: {0}]   ;;  %s1965_s10 = inlined_call_operand.hbm [shape: f32[2,2,8,8], index: 10, kind: output, shape index: {1}]  }
   0x1   :  { %1967 = sst [smem:[#allocation8_spill]] %s1955_s0 }
   0x2   :  { %1968 = sst [smem:[#allocation9_spill]] %s1956_s1 }
   0x3   :  { %1969 = sst [smem:[#allocation10_spill]] %s1957_s2 }
   0x4   :  { %16 = vsyncpa [#allocation3], 0 }
   0x5   :  { %18 = vsyncpa [#allocation3 + $0x1], 0 }
   0x6   :  { %19 = vsyncpa [#allocation5], 0 }
   0x7   :  { %21 = vsyncpa [#allocation5 + $0x1], 0  ;;  %s1671_s13 = smov 0   ;;  %s1673_s14 = smov 0  }
   0x8   :  { %s1675_s15 = smov 0   ;;  %s1677_s16 = smov 0  }
   0x9 LB: > { %s1692_s17 = sadd.s32 4294967295, %s1607_s16   ;;  %s1268_s18 = sadd.s32 4294967294, %s1607_s16   ;;  %s1607_s16 = sphi %s1677_s16, %s1979_s16   ;;  %s1603_s15 = sphi %s1675_s15, %s1978_s15   ;;  %s1599_s14 = sphi %s1673_s14, %s1977_s14   ;;  %s1595_s13 = sphi %s1671_s13, %s1976_s13  }
   0xa   : > { %s1696_s19 = sadd.s32 1, %s1607_s16   ;;  %s238_s20 = sadd.s32 1, %s1603_s15 }
   0xb   : > { %s235_s21 = ssub.s32 %s1607_s16, %s1696_s19  ;;  %p248_p0 = scmp.ne.s32.totalorder %s1603_s15, %s1599_s14 }
   0xc   : > { %p236_p1 = scmp.eq.s32.totalorder %s235_s21, 0  ;;  %p249_p2 = scmp.eq.s32.totalorder %s1692_s17, 1 }
   0xd   : > { %p254_p3 = scmp.ne.s32.totalorder %s1599_s14, %s1595_s13  ;;  %p255_p4 = scmp.eq.s32.totalorder %s1268_s18, 1 }
   0xe   : > { %s1707_s22 = scalar_select %p236_p1, %s1603_s15, %s238_s20  }
   0xf   : > { %p1709_p5 = por %p249_p2, %p248_p0  ;;  %p1713_p6 = por %p255_p4, %p254_p3 }
  0x10   : > { %p1271_p7 = scmp.ge.s32.totalorder %s1607_s16, 1  ;;  %p338_p8 = scmp.lt.s32.totalorder %s1607_s16, 3 }
  0x12   : > { %p339_p9 = pnand %p1271_p7, %p338_p8 }
  0x13   : > { %v1489_v0 = vld [vmem:[%s1959_s4] sm:$0xff] (!%p339_p9)   ;;  %v1609_v1 = vmov (!%p339_p9), 0.0   ;;  %v1490_v2 = vld [vmem:[%s1959_s4 + $0x8] sm:$0xff] (!%p339_p9)   ;;  %vm1610_vm0 = vmmov (!%p339_p9), 0   ;;  %p388_p10 = scmp.lt.s32.totalorder (!%p339_p9), %s1692_s17, 1  ;;  %s1972_s1 = sld [smem:[#allocation9_spill]] (!%p339_p9) }
  0x14   : > { %342 = sbr.rel (%p339_p9) target bundleno = 2311 (0x907), region = 56  ;;  %1364 = vmatprep.subr.bf16.mxu1 (!%p339_p9), %v1609_v1  ;;  %1356 = vmatprep.subr.bf16.mxu0 (!%p339_p9), %v1609_v1  ;;  %v1491_v3 = vld [vmem:[%s1958_s3] sm:$0xff] (!%p339_p9)   ;;  %v1492_v4 = vld [vmem:[%s1958_s3 + $0x8] sm:$0xff] (!%p339_p9)   ;;  %s1973_s0 = sld [smem:[#allocation8_spill]] (!%p339_p9)  ;;  %vm433_vm1 = vcmask (!%p339_p9), 261120   ;;  %vm590_vm2 = vcmask (!%p339_p9), 130048  }
  0x15   : > { %1365 = vmatpush3.bf16.msra.mxu1 (!%p339_p9), %v1489_v0  ;;  %1368 = vmatprep.mubr.msk.bf16.mxu1 (!%p339_p9), %vm1610_vm0, %v1609_v1  ;;  %v1493_v20 = vld [vmem:[%s1960_s5] sm:$0xff] (!%p339_p9)   ;;  %s1974_s2 = sld [smem:[#allocation10_spill]] (!%p339_p9)  ;;  %v1494_v21 = vld [vmem:[%s1960_s5 + $0x8] sm:$0xff] (!%p339_p9)   ;;  %vm637_vm3 = vcmask (!%p339_p9), 64512   ;;  %vm657_vm4 = vcmask (!%p339_p9), 1043456   ;;  %v1497_v40 = vld [vmem:[%s1958_s3 + $0x10] sm:$0xff] (!%p339_p9)  }
  0x16   : > { %1366 = vmatprep.subr.bf16.mxu1 (!%p339_p9), %v1609_v1  ;;  %1360 = vmatprep.mubr.msk.bf16.mxu0 (!%p339_p9), %vm1610_vm0, %v1609_v1  ;;  %v1498_v41 = vld [vmem:[%s1958_s3 + $0x18] sm:$0xff] (!%p339_p9)   ;;  %s1805_s30 = sand.u32 (!%p339_p9), 1, %s1599_s14   ;;  %v1495_v48 = vld [vmem:[%s1959_s4 + $0x10] sm:$0xff] (!%p339_p9)   ;;  %s1611_s18 = smov (!%p339_p9), [#allocation4]  }
  0x17   : > { %1357 = vmatpush3.bf16.msra.mxu0 (!%p339_p9), %v1491_v3  ;;  %v1496_v50 = vld [vmem:[%s1959_s4 + $0x18] sm:$0xff] (!%p339_p9)   ;;  %v1499_v3 = vld [vmem:[%s1960_s5 + $0x10] sm:$0xff] (!%p339_p9)   ;;  %s1517_s25 = sshll.u32 (!%p339_p9), %s1611_s18, 4  ;;  %s1518_s25 = int_to_ptr.vmem [resolvable:$false] %s1517_s25 }
  0x18   : > { %1358 = vmatprep.subr.bf16.mxu0 (!%p339_p9), %v1609_v1 }
  0x19   : > { %1367 = vmatpush3.bf16.msra.mxu1 (!%p339_p9), %v1490_v2 }
  0x1a   : > { %1380 = vmatprep.subr.bf16.mxu1 (!%p339_p9), %v1609_v1 }
  0x1b   : > { %s389_s11 = scalar_select %p388_p10, %s1692_s17, 1  ;;  %1359 = vmatpush3.bf16.msra.mxu0 %v1492_v4  ;;  %v1500_v4 = vld [vmem:[%s1960_s5 + $0x18] sm:$0xff]  }
  0x1c   : > { %1372 = vmatprep.subr.bf16.mxu0 %v1609_v1 }
  0x1d   : > { %s1741_s20 = sshll.u32 %s389_s11, 3  ;;  %s1273_s11 = sshll.u32 %s1805_s30, 4 }
  0x1e   : > { %s395_s26 = scalar_lea.vmem %s1972_s1, %s1741_s20  ;;  %s391_s29 = scalar_lea.vmem %s1973_s0, %s1741_s20 }
  0x1f   : > { %v403_v5 = vld [vmem:[%s395_s26] sm:$0xff]  ;;  %s399_s21 = scalar_lea.vmem %s1974_s2, %s1741_s20  ;;  %s1966_s26 = sshll.u32 %s1692_s17, 7 }
  0x20   : > { %v1752_v6 = vld [vmem:[%s391_s29] sm:$0xff]  ;;  %v1754_v7 = vpack.c.bf16 %v403_v5, %v403_v5  ;;  %s1870_s28 = scalar_lea.hbm %s1965_s10, %s1966_s26  ;;  %s1519_s0 = scalar_lea.vmem %s1518_s25, 512 }
  0x21   : > { %v402_v8 = vpack.c.bf16 %v1752_v6, %v1752_v6  ;;  %v405_v22 = vld [vmem:[%s399_s21] sm:$0xff]  ;;  %s1811_s21 = scalar_lea.vmem [#allocation4], %s1273_s11  ;;  %s1125_s11 = scalar_lea.sflag [#allocation5], %s1805_s30 }
  0x22   : > { %1369 = vmatmul.mubr.msk.bf16.vlgmr.msra.gmra.mrb[0].mxu1 %vm433_vm1, %v1754_v7  ;;  %v1782_v23 = vpack.c.bf16 %v405_v22, %v405_v22  ;;  %v1502_v22 = vld [vmem:[%s1961_s6 + $0x8] sm:$0xff]   ;;  %s1150_s29 = sshll.u32 %s1811_s21, 4  ;;  %s1873_s29 = int_to_ptr.vmem [resolvable:$true] %s1150_s29 }
  0x23   : > { %1361 = vmatmul.mubr.msk.bf16.vlgmr.msra.gmra.mrb[0].mxu0 %vm433_vm1, %v402_v8  ;;  %1382 = vmatprep.mubr.msk.bf16.mxu1 %vm1610_vm0, %v1609_v1  ;;  %s1513_s12 = scalar_lea.vmem %s1873_s29, 256  ;;  %p1520_p0 = scmp.lt.s32.totalorder %s1873_s29, %s1518_s25 }
  0x24   : > { %1376 = vmatprep.mubr.msk.bf16.mxu0 %vm1610_vm0, %v1609_v1  ;;  %1373 = vmatpush3.bf16.msra.mxu0 %v1493_v20  ;;  %p1514_p11 = scmp.ne.s32.totalorder %s1873_s29, %s1513_s12  ;;  %p1521_p1 = scmp.lt.s32.totalorder %s1519_s0, %s1513_s12 }
  0x25   : > { %1374 = vmatprep.subr.bf16.mxu0 %v1609_v1 }
  0x26   : > { %p1515_p12 = pnand %p1514_p11, %p1709_p5  ;;  %p1522_p2 = por %p1521_p1, %p1520_p0 }
  0x28   : > { %1375 = vmatpush3.bf16.msra.mxu0 %v1494_v21  ;;  %p1516_p13 = pneg %p1515_p12 }
  0x29   : > { %1386 = vmatprep.subr.bf16.mxu0 %v1609_v1 }
  0x2a   : > { %p1523_p3 = pnand %p1522_p2, %p1516_p13 }
  0x2b   : > { %1377 = vmatmul.mubr.msk.bf16.vlgmr.msra.gmra.mrb[4].mxu0 %vm433_vm1, %v1782_v23 }
  0x2c   : > { %1388 = vmatprep.mubr.msk.bf16.mxu0 %vm1610_vm0, %v1609_v1 }
  0xf5   : > { %v526_v9 = vpop.f32.mrb[0].mxu1 }
  0xf6   : > { %v471_v10 = vpop.f32.mrb[0].mxu0  ;;  %v588_v11 = vpack.c.bf16 %v526_v9, %v526_v9  ;;  %v1370_v12 = vpop.f32.mrb[1].mxu1 }
  0xf7   : > { %v1362_v13 = vpop.f32.mrb[1].mxu0  ;;  %v529_v14 = vpop.f32.mrb[2].mxu1  ;;  %v587_v19 = vpack.c.bf16 %v471_v10, %v471_v10 }
  0xf8   : > { %v474_v15 = vpop.f32.mrb[2].mxu0  ;;  %v595_v16 = vsel %vm590_vm2, %v588_v11, 0  ;;  %v1371_v17 = vpop.f32.mrb[3].mxu1 }
  0xf9   : > { %v1363_v18 = vpop.f32.mrb[3].mxu0  ;;  %1381 = vmatpush3.bf16.xpose.msra.mxu1 %v595_v16 }
  0xfa   : > { %1392 = vmatprep.subr.bf16.mxu1 %v1609_v1 }
  0xfe   : > { %v581_v34 = vpop.f32.mrb[4].mxu0 }
  0xff   : > { %v1378_v35 = vpop.f32.mrb[5].mxu0  ;;  %v589_v38 = vpack.c.bf16 %v581_v34, %v581_v34 }
 0x100   : > { %1383 = vmatmul.mubr.msk.bf16.vlgmr.msra.gmra.mrb[4].mxu1 %vm590_vm2, %v587_v19  ;;  %v584_v36 = vpop.f32.mrb[6].mxu0 }
 0x101   : > { %1396 = vmatprep.mubr.msk.bf16.mxu1 %vm1610_vm0, %v1609_v1  ;;  %v1379_v37 = vpop.f32.mrb[7].mxu0  ;;  %v659_v39 = vsel %vm657_vm4, %v589_v38, 0  ;;  %1393 = vmatpush3.bf16.msra.mxu1 %v1497_v40 }
 0x102   : > { %1387 = vmatpush3.bf16.msra.mxu0 %v659_v39  ;;  %1394 = vmatprep.subr.bf16.mxu1 %v1609_v1 }
 0x103   : > { %1400 = vmatprep.subr.bf16.mxu0 %v1609_v1 }
 0x105   : > { %1395 = vmatpush3.bf16.msra.mxu1 %v1498_v41 }
 0x106   : > { %1408 = vmatprep.subr.bf16.mxu1 %v1609_v1 }
 0x108   : > { %1397 = vmatmul.mubr.msk.bf16.vlgmr.msra.gmra.mrb[8].mxu1 %vm433_vm1, %v402_v8 }
 0x109   : > { %1412 = vmatprep.mubr.msk.bf16.mxu1 %vm1610_vm0, %v1609_v1  ;;  %1409 = vmatpush3.bf16.msra.mxu1 %v1499_v3 }
 0x10a   : > { %1410 = vmatprep.subr.bf16.mxu1 %v1609_v1 }
 0x10d   : > { %1411 = vmatpush3.bf16.msra.mxu1 %v1500_v4 }
 0x10e   : > { %1422 = vmatprep.subr.bf16.mxu1 %v1609_v1 }
 0x110   : > { %1413 = vmatmul.mubr.msk.bf16.vlgmr.msra.gmra.mrb[12].mxu1 %vm433_vm1, %v1782_v23 }
 0x111   : > { %1424 = vmatprep.mubr.msk.bf16.mxu1 %vm1610_vm0, %v1609_v1 }
 0x1d3   : > { %v631_v24 = vpop.f32.mrb[4].mxu1 }
 0x1d4   : > { %v1384_v25 = vpop.f32.mrb[5].mxu1  ;;  %v638_v26 = vsel %vm637_vm3, %v631_v24, -inf }
 0x1d5   : > { %639 = vmax.xlane.f32.xlu0 %v638_v26  ;;  %v634_v27 = vpop.f32.mrb[6].mxu1 }
 0x1d6   : > { %v1385_v28 = vpop.f32.mrb[7].mxu1 }
 0x1db   : > { %v766_v51 = vpop.f32.mrb[8].mxu1 }
 0x1dc   : > { %v1398_v52 = vpop.f32.mrb[9].mxu1  ;;  %v876_v2 = vpack.c.bf16 %v766_v51, %v766_v51 }
 0x1dd   : > { %v769_v53 = vpop.f32.mrb[10].mxu1 }
 0x1de   : > { %v1399_v54 = vpop.f32.mrb[11].mxu1 }
 0x1e3   : > { %v870_v16 = vpop.f32.mrb[12].mxu1 }
 0x1e4   : > { %v1414_v17 = vpop.f32.mrb[13].mxu1  ;;  %v878_v20 = vpack.c.bf16 %v870_v16, %v870_v16 }
 0x1e5   : > { %v873_v18 = vpop.f32.mrb[14].mxu1 }
 0x1e6   : > { %v1415_v19 = vpop.f32.mrb[15].mxu1  ;;  %v946_v21 = vsel %vm657_vm4, %v878_v20, 0 }
 0x1e7   : > { %1423 = vmatpush3.bf16.msra.mxu1 %v946_v21 }
 0x1e8   : > { %1434 = vmatprep.subr.bf16.mxu1 %v1609_v1 }
 0x262   : > { %v640_v29 = vpop.xlane.xlu0 %639 }
 0x263   : > { %v641_v30 = vsub.f32 %v631_v24, %v640_v29  ;;  %v1501_v29 = vld [vmem:[%s1961_s6] sm:$0xff]  }
 0x265   : > { %v642_v31 = vmul.f32 1.442695, %v641_v30 }
 0x267   : > { %1503 = vpow2.f32 %v642_v31 }
 0x271   : > { %v1504_v32 = vpop.eup %1503 }
 0x272   : > { %v644_v33 = vsel %vm637_vm3, %v1504_v32, 0.0 }
 0x273   : > { %645 = vadd.xlane.f32.xlu0 %v644_v33 }
 0x300   : > { %v646_v42 = vpop.xlane.xlu0 %645 }
 0x301   : > { %1505 = vrcp.f32 %v646_v42 }
 0x30b   : > { %v1506_v43 = vpop.eup %1505 }
 0x30c   : > { %v648_v44 = vmul.f32 %v1506_v43, %v646_v42 }
 0x30e   : > { %v649_v45 = vsub.f32 2.0, %v648_v44 }
 0x310   : > { %v650_v46 = vmul.f32 %v1506_v43, %v649_v45 }
 0x312   : > { %v651_v47 = vmul.f32 %v1504_v32, %v650_v46 }
 0x314   : > { %v653_v49 = vpack.c.bf16 %v651_v47, %v651_v47  ;;  %652 = vst.msk [vmem:[%s1811_s21] sm:$0xff] %vm637_vm3, %v651_v47 }
 0x316   : > { %1389 = vmatmul.mubr.msk.bf16.vlgmr.msra.gmra.mrb[8].mxu0 %vm637_vm3, %v653_v49 }
 0x317   : > { %1401 = vmatpush3.bf16.msra.mxu0 %v1495_v48  ;;  %1404 = vmatprep.mubr.msk.bf16.mxu0 %vm1610_vm0, %v1609_v1 }
 0x318   : > { %1402 = vmatprep.subr.bf16.mxu0 %v1609_v1 }
 0x31b   : > { %1403 = vmatpush3.bf16.msra.mxu0 %v1496_v50 }
 0x31c   : > { %1416 = vmatprep.subr.bf16.mxu0 %v1609_v1 }
 0x31e   : > { %1405 = vmatmul.mubr.msk.bf16.vlgmr.msra.gmra.mrb[12].mxu0 %vm433_vm1, %v1754_v7 }
 0x31f   : > { %1418 = vmatprep.mubr.msk.bf16.mxu0 %vm1610_vm0, %v1609_v1 }
 0x3e9   : > { %v695_v55 = vpop.f32.mrb[8].mxu0 }
 0x3ea   : > { %v1390_v56 = vpop.f32.mrb[9].mxu0  ;;  %v701_v31 = vpack.c.bf16 %v695_v55, %v695_v55 }
 0x3eb   : > { %v698_v57 = vpop.f32.mrb[10].mxu0 }
 0x3ec   : > { %v1391_v58 = vpop.f32.mrb[11].mxu0 }
 0x3f1   : > { %v818_v59 = vpop.f32.mrb[12].mxu0 }
 0x3f2   : > { %v877_v60 = vpack.c.bf16 %v818_v59, %v818_v59  ;;  %v1406_v61 = vpop.f32.mrb[13].mxu0 }
 0x3f3   : > { %v821_v62 = vpop.f32.mrb[14].mxu0 }
 0x3f4   : > { %v883_v63 = vsel %vm590_vm2, %v877_v60, 0  ;;  %v1407_v0 = vpop.f32.mrb[15].mxu0 }
 0x3f5   : > { %1417 = vmatpush3.bf16.xpose.msra.mxu0 %v883_v63 }
 0x3f6   : > { %1428 = vmatprep.subr.bf16.mxu0 %v1609_v1 }
 0x3fc   : > { %1419 = vmatmul.mubr.msk.bf16.vlgmr.msra.gmra.mrb[16].mxu0 %vm590_vm2, %v876_v2 }
 0x3fd   : > { %1430 = vmatprep.mubr.msk.bf16.mxu0 %vm1610_vm0, %v1609_v1  ;;  %1429 = vmatpush3.bf16.msra.mxu0 %v1502_v22 }
 0x4cf   : > { %v919_v5 = vpop.f32.mrb[16].mxu0 }
 0x4d0   : > { %v1420_v7 = vpop.f32.mrb[17].mxu0  ;;  %v925_v8 = vsel %vm637_vm3, %v919_v5, -inf }
 0x4d1   : > { %926 = vmax.xlane.f32.xlu1 %v925_v8  ;;  %v922_v9 = vpop.f32.mrb[18].mxu0 }
 0x4d2   : > { %v1421_v10 = vpop.f32.mrb[19].mxu0 }
 0x55e   : > { %v927_v11 = vpop.xlane.xlu1 %926 }
 0x55f   : > { %v928_v12 = vsub.f32 %v919_v5, %v927_v11 }
 0x561   : > { %v929_v13 = vmul.f32 1.442695, %v928_v12 }
 0x563   : > { %1507 = vpow2.f32 %v929_v13 }
 0x56d   : > { %v1508_v14 = vpop.eup %1507 }
 0x56e   : > { %v931_v15 = vsel %vm637_vm3, %v1508_v14, 0.0 }
 0x56f   : > { %932 = vadd.xlane.f32.xlu1 %v931_v15 }
 0x5fc   : > { %v933_v23 = vpop.xlane.xlu1 %932 }
 0x5fd   : > { %1509 = vrcp.f32 %v933_v23 }
 0x607   : > { %v1510_v24 = vpop.eup %1509 }
 0x608   : > { %v935_v25 = vmul.f32 %v1510_v24, %v933_v23 }
 0x60a   : > { %v936_v26 = vsub.f32 2.0, %v935_v25 }
 0x60c   : > { %v937_v27 = vmul.f32 %v1510_v24, %v936_v26 }
 0x60e   : > { %v938_v28 = vmul.f32 %v1508_v14, %v937_v27 }
 0x610   : > { %v941_v30 = vpack.c.bf16 %v938_v28, %v938_v28  ;;  %1312 = vst.msk [vmem:[%s1811_s21 + $0x8] sm:$0xff] %vm637_vm3, %v938_v28 }
 0x612   : > { %1425 = vmatmul.mubr.msk.bf16.vlgmr.msra.gmra.mrb[16].mxu1 %vm637_vm3, %v941_v30 }
 0x613   : > { %1435 = vmatpush3.bf16.msra.mxu1 %v1501_v29  ;;  %1436 = vmatprep.mubr.msk.bf16.mxu1 %vm1610_vm0, %v1609_v1 }
 0x61a   : > { %1437 = vmatmul.mubr.msk.bf16.vlgmr.msra.gmra.mrb[20].mxu1 %vm590_vm2, %v701_v31 }
 0x6e5   : > { %v982_v32 = vpop.f32.mrb[16].mxu1 }
 0x6e6   : > { %v988_v33 = vpack.c.bf16 %v982_v32, %v982_v32  ;;  %v1426_v34 = vpop.f32.mrb[17].mxu1 }
 0x6e7   : > { %v985_v35 = vpop.f32.mrb[18].mxu1 }
 0x6e8   : > { %v1427_v36 = vpop.f32.mrb[19].mxu1  ;;  %1431 = vmatmul.mubr.msk.bf16.vlgmr.msra.gmra.mrb[20].mxu0 %vm590_vm2, %v988_v33 }
 0x6ed   : > { %v1081_v37 = vpop.f32.mrb[20].mxu1 }
 0x6ee   : > { %v1438_v38 = vpop.f32.mrb[21].mxu1 }
 0x6ef   : > { %v1084_v39 = vpop.f32.mrb[22].mxu1 }
 0x6f0   : > { %v1439_v40 = vpop.f32.mrb[23].mxu1 }
 0x7bb   : > { %v1032_v41 = vpop.f32.mrb[20].mxu0 }
 0x7bc   : > { %v1082_v42 = vadd.f32 %v1081_v37, %v1032_v41  ;;  %v1432_v1 = vpop.f32.mrb[21].mxu0 }
 0x7bd   : > { %v1035_v43 = vpop.f32.mrb[22].mxu0 }
 0x7be   : > { %v1433_v44 = vpop.f32.mrb[23].mxu0  ;;  %v1087_v45 = vadd.f32 %v1082_v42, %v1752_v6 }
 0x7c0   : > { %v1088_v46 = vsel %vm433_vm1, %v1087_v45, 0.0 }
 0x7c1   : > { %1089 = vadd.xlane.f32.xlu0 %v1088_v46 }
 0x84e   : > { %v1090_v47 = vpop.xlane.xlu0 %1089 }
 0x84f   : > { %v1092_v48 = vmul.f32 0.03125, %v1090_v47 }
 0x851   : > { %v1093_v49 = vsub.f32 %v1087_v45, %v1092_v48 }
 0x853   : > { %v1094_v50 = vmul.f32 %v1093_v49, %v1093_v49 }
 0x855   : > { %v1095_v51 = vsel %vm433_vm1, %v1094_v50, 0.0 }
 0x856   : > { %1096 = vadd.xlane.f32.xlu1 %v1095_v51 }
 0x857   : > { %1526 = shalt.err (!%p1523_p3)
}
 0x858   : > { %s1527_s21 = scalar_lea.hbm %s1870_s28, 256  ;;  %s1531_s18 = scalar_lea.hbm %s1965_s10, 512 }
 0x859   : > { %p1528_p4 = scmp.ne.s32.totalorder %s1870_s28, %s1527_s21  ;;  %p1532_p9 = scmp.lt.u32.totalorder %s1870_s28, %s1965_s10 }
 0x85a   : > { %p1533_p10 = scmp.lt.u32.totalorder %s1531_s18, %s1527_s21  ;;  %p1535_p12 = scmp.lt.u32.totalorder %s1527_s21, %s1870_s28 }
 0x85b   : > { %p1529_p7 = pnand %p1528_p4, %p1709_p5 }
 0x85c   : > { %p1534_p11 = por %p1533_p10, %p1532_p9 }
 0x85d   : > { %p1530_p8 = pneg %p1529_p7 }
 0x85e   : > { %p1536_p13 = por %p1535_p12, %p1534_p11 }
 0x860   : > { %p1537_p0 = pnand %p1536_p13, %p1530_p8 }
 0x862   : > { %1540 = shalt.err (!%p1537_p0)
}
 0x863   : > { %s1612_s0 = smov 128   ;;  %s1613_s12 = smov 256   ;;  %v1318_v55 = vld [vmem:[%s1962_s7] ss:$0 sm:$0xff] }
 0x864   : > { %s1614_s20 = smov 8   ;;  %s1272_s26 = sshll.u32 %s1805_s30, 3  ;;  %v1319_v57 = vld [vmem:[%s1963_s8] ss:$0 sm:$0xff] }
 0x865   : > { %1441 = dma.vmem_to_hbm [thread:$0]  (%p1709_p5), %s1873_s29, 256, %s1870_s28, %s1125_s11, %s1612_s0, %s1613_s12, %s1614_s20  }
 0x866   : > { %s380_s1 = scalar_lea.vmem [#allocation2], %s1272_s26  ;;  %s1975_s28 = sshll.u32 %s1692_s17, 7 }
 0x867   : > { %s1138_s2 = sshll.u32 %s380_s1, 4  ;;  %s1911_s0 = scalar_lea.hbm %s1964_s9, %s1975_s28  ;;  %s1913_s2 = int_to_ptr.vmem [resolvable:$true] %s1138_s2 }
 0x868   : > { %s1120_s12 = scalar_lea.sflag [#allocation3], %s1805_s30  ;;  %s1541_s20 = scalar_lea.vmem %s1913_s2, 128 }
 0x869   : > { %p1542_p1 = scmp.ne.s32.totalorder %s1913_s2, %s1541_s20  ;;  %s1615_s26 = smov [#allocation2]  }
 0x86a   : > { %s1545_s17 = sshll.u32 %s1615_s26, 4  ;;  %s1546_s17 = int_to_ptr.vmem [resolvable:$false] %s1545_s17 }
 0x86b   : > { %p1543_p2 = pnand %p1542_p1, %p1709_p5  ;;  %s1547_s21 = scalar_lea.vmem %s1546_s17, 256 }
 0x86c   : > { %p1548_p4 = scmp.lt.s32.totalorder %s1913_s2, %s1546_s17  ;;  %p1549_p7 = scmp.lt.s32.totalorder %s1547_s21, %s1541_s20 }
 0x86d   : > { %p1544_p3 = pneg %p1543_p2 }
 0x86e   : > { %p1550_p8 = por %p1549_p7, %p1548_p4 }
 0x870   : > { %p1551_p9 = pnand %p1550_p8, %p1544_p3 }
 0x8e3   : > { %v1097_v6 = vpop.xlane.xlu1 %1096 }
 0x8e4   : > { %v1098_v52 = vmul.f32 0.03125, %v1097_v6 }
 0x8e6   : > { %v1099_v53 = vadd.f32 1e-05, %v1098_v52 }
 0x8e8   : > { %1511 = vrsqrt.f32 %v1099_v53 }
 0x8f2   : > { %v1512_v54 = vpop.eup %1511 }
 0x8f3   : > { %v1101_v56 = vmul.f32 %v1512_v54, %v1093_v49 }
 0x8f5   : > { %v1109_v58 = vmul.f32 %v1318_v55, %v1101_v56 }
 0x8f7   : > { %v1117_v59 = vadd.f32 %v1319_v57, %v1109_v58 }
 0x8f9   : > { %1118 = vst.msk [vmem:[%s380_s1] sm:$0xff] %vm433_vm1, %v1117_v59 }
 0x8fa   : > { %1554 = shalt.err (!%p1551_p9)
}
 0x8fb   : > { %s1555_s1 = scalar_lea.hbm %s1911_s0, 128  ;;  %s1559_s18 = scalar_lea.hbm %s1964_s9, 256 }
 0x8fc   : > { %p1556_p10 = scmp.ne.s32.totalorder %s1911_s0, %s1555_s1  ;;  %p1560_p13 = scmp.lt.u32.totalorder %s1911_s0, %s1964_s9 }
 0x8fd   : > { %p1561_p0 = scmp.lt.u32.totalorder %s1559_s18, %s1555_s1  ;;  %p1563_p2 = scmp.lt.u32.totalorder %s1555_s1, %s1911_s0 }
 0x8fe   : > { %p1557_p11 = pnand %p1556_p10, %p1709_p5 }
 0x8ff   : > { %p1562_p1 = por %p1561_p0, %p1560_p13 }
 0x900   : > { %p1558_p12 = pneg %p1557_p11 }
 0x901   : > { %p1564_p3 = por %p1563_p2, %p1562_p1 }
 0x903   : > { %p1565_p4 = pnand %p1564_p3, %p1558_p12 }
 0x905   : > { %1568 = shalt.err (!%p1565_p4)
}
 0x906   : > { %1440 = dma.vmem_to_hbm [thread:$0]  (%p1709_p5), %s1913_s2, 128, %s1911_s0, %s1120_s12  }
 0x907 PF: > { %p1451_p7 = scmp.ge.s32.totalorder %s1607_s16, 2  ;;  %s1165_s29 = sand.u32 1, %s1595_s13  }
 0x908   : > { %s1166_s11 = scalar_lea.sflag [#allocation3], %s1165_s29 }
 0x909   : > { %p1445_p8 = pnand %p1451_p7, %p1713_p6 }
 0x90b   : > { %1586 = dma.done.wait (!%p1445_p8), %s1166_s11, 128  }
 0x90c   : > { %1588 = vsyncadd (!%p1445_p8), %s1166_s11, 4294967168  ;;  %s1175_s20 = scalar_lea.sflag [#allocation5], %s1165_s29 }
 0x90d   : > { %1590 = dma.done.wait (!%p1445_p8), %s1175_s20, 256  }
 0x90e   : > { %1592 = vsyncadd (!%p1445_p8), %s1175_s20, 4294967040  ;;  %p24_p5 = scmp.ge.s32.totalorder %s1696_s19, 4   ;;  %s1976_s13 = smov %s1599_s14 }
 0x90f   : > { %s1977_s14 = smov %s1603_s15  ;;  %s1978_s15 = smov %s1707_s22 }
 0x910   : > { %s1979_s16 = smov %s1696_s19  ;;  %26 = sbr.rel (!%p24_p5) target bundleno = 9 (0x9), region = 119 }
 0x917   :  { %1180 = vsyncpa [#allocation3], 1 }
 0x918   :  { %1182 = vsyncpa [#allocation3 + $0x1], 1 }
 0x919   :  { %1183 = vsyncpa [#allocation5], 1 }
 0x91a   :  { %1185 = vsyncpa [#allocation5 + $0x1], 1 }

</bundles_post_ra>
